<compile_context>
chip_gen: v7x
topology: tpu7x:2x2x1
jax: 0.10.0
libtpu: 0.0.40
codegen_flags: <defaults>
</compile_context>

<pallas_src>
import functools

import jax
import jax.numpy as jnp
from jax.experimental import pallas as pl
from jax.experimental.pallas import tpu as pltpu


def temporal_attention_kernel(x_ref, wqkv_t_ref, bqkv_ref, wproj_t_ref, bproj_ref,
                              o_ref, *, num_heads, seq_len, matmul_dtype):
    """One grid step == TB batch elements flattened to R = TB*N rows.

    x_ref:       (R, C)    VMEM   (matmul_dtype)
    wqkv_t_ref:  (C, 3C)   VMEM   (qkv weight, pre-transposed; scale folded into Q)
    bqkv_ref:    (1, 3C)   VMEM   f32 (scale folded into Q part)
    wproj_t_ref: (C, C)    VMEM   (proj weight, pre-transposed)
    bproj_ref:   (1, C)    VMEM   f32
    o_ref:       (R, C)    VMEM
    """
    R, C = x_ref.shape
    H = num_heads
    N = seq_len
    TB = R // N
    hd = C // H
    mdt = jnp.dtype(matmul_dtype)

    def mm(a):  # cast MXU operands only; softmax / accumulation stay f32
        return a if a.dtype == mdt else a.astype(mdt)

    # Fused QKV projection: one fat (R, C) @ (C, 3C) MXU matmul, f32 accumulate.
    # Column layout is [q|k|v][H][hd], identical to reshape(B, N, 3, H, hd).
    qkv = jnp.dot(x_ref[...], wqkv_t_ref[...],
                  preferred_element_type=jnp.float32) + bqkv_ref[...]

    # Wide contiguous C-lane slices + one head-major relayout each:
    # (R, C) -> (TB, N, H, hd) -> (TB, H, N, hd) -> (TB*H, N, hd).
    def to_heads(block):
        t = jnp.transpose(block.reshape(TB, N, H, hd), (0, 2, 1, 3))
        return t.reshape(TB * H, N, hd)

    q = to_heads(qkv[:, :C])
    k = to_heads(qkv[:, C:2 * C])
    v = to_heads(qkv[:, 2 * C:])

    # Batched attention over TB*H independent (N, N) problems (scale already in q).
    s = jnp.einsum('brd,bsd->brs', mm(q), mm(k),
                   preferred_element_type=jnp.float32)
    # Hemodynamic mask buffer holds {1.0, -inf}: `mask == 0` never holds -> no mask.
    m = jnp.max(s, axis=-1, keepdims=True)
    p = jnp.exp(s - m)
    p = p * pl.reciprocal(jnp.sum(p, axis=-1, keepdims=True), approx=True)

    o = jnp.einsum('brs,bsd->brd', mm(p), mm(v),
                   preferred_element_type=jnp.float32)

    # Head concat back to (R, C) rows (inverse relayout), then one fat output
    # projection: the head sum is folded into the K = C MXU contraction.
    o2 = jnp.transpose(o.reshape(TB, H, N, hd), (0, 2, 1, 3)).reshape(R, C)
    y = jnp.dot(mm(o2), wproj_t_ref[...],
                preferred_element_type=jnp.float32) + bproj_ref[...]
    o_ref[...] = y.astype(o_ref.dtype)


def temporal_attention(x, wqkv, bqkv, wproj, bproj, *, num_heads,
                       batch_block=None, matmul_dtype=jnp.float32):
    """x: (B, N, C); wqkv: (3C, C); bqkv: (3C,); wproj: (C, C); bproj: (C,)."""
    B, N, C = x.shape
    H = num_heads
    assert C % H == 0
    hd = C // H
    scale = float(hd) ** (-0.5)
    mdt = jnp.dtype(matmul_dtype)

    # ---- choose how many batch elements to fold per grid step ----------------
    # Per-step attention work is linear in tb (batched (tb*H, N, N) form), so we
    # only need enough rows for fat projections.  Target ~128 rows, keep >=2
    # grid steps when B allows (v7x megacore), keep the block (8,128)-legal.
    if batch_block is None:
        cap = B if B == 1 else max(1, B // 2)
        target = min(cap, max(1, -(-128 // N)))      # ceil(128/N), capped
        tb = None
        for cand in range(target, 0, -1):
            if B % cand == 0 and (cand * N) % 8 == 0:
                tb = cand
                break
        if tb is None:
            tb = B                                   # full fold: always legal
    else:
        tb = int(batch_block)
        assert B % tb == 0
        assert (tb * N) % 8 == 0 or tb == B
    R = tb * N
    grid = (B // tb,)

    # ---- parameter / input plumbing (trace time, free) -----------------------
    f32 = jnp.float32
    wqkv_f = jnp.asarray(wqkv, f32)                            # (3C, C)
    bqkv_f = jnp.asarray(bqkv, f32)                            # (3C,)
    # Fold the softmax scale into the Q output features (first C rows/entries).
    row_scale = jnp.concatenate([jnp.full((C,), scale, f32),
                                 jnp.ones((2 * C,), f32)])
    wqkv_t = (wqkv_f * row_scale[:, None]).T                   # (C, 3C)
    bqkv2 = (bqkv_f * row_scale).reshape(1, 3 * C)             # f32
    wproj_t = jnp.asarray(wproj, f32).T                        # (C, C)
    bproj2 = jnp.asarray(bproj, f32).reshape(1, C)             # f32

    x2 = x.reshape(B * N, C)                                   # 2-D, lane axis last
    if mdt != jnp.dtype(f32):                                  # pre-cast once (DMA lever)
        wqkv_t = wqkv_t.astype(mdt)
        wproj_t = wproj_t.astype(mdt)
        x2 = x2.astype(mdt)

    kernel = functools.partial(temporal_attention_kernel, num_heads=H,
                               seq_len=N, matmul_dtype=mdt)

    itm = mdt.itemsize
    cost = pl.CostEstimate(
        flops=(2 * B * N * C * 3 * C            # QKV projection
               + 4 * B * H * N * N * hd         # scores + PV
               + 2 * B * N * C * C),            # output projection
        transcendentals=B * H * N * N,
        bytes_accessed=(itm * (B * N * C + 4 * C * C)
                        + 4 * (4 * C)
                        + jnp.dtype(x.dtype).itemsize * B * N * C),
    )

    # TODO(synk): for much larger C, single-buffer the resident weight specs
    # (pipeline_mode=pl.Buffered(1)) to halve their VMEM footprint on v7x.
    out2 = pl.pallas_call(
        kernel,
        out_shape=jax.ShapeDtypeStruct((B * N, C), x.dtype),
        grid_spec=pltpu.PrefetchScalarGridSpec(
            num_scalar_prefetch=0,
            grid=grid,
            in_specs=[
                pl.BlockSpec((R, C), lambda i: (i, 0)),        # x rows for this step
                pl.BlockSpec((C, 3 * C), lambda i: (0, 0)),    # Wqkv^T (resident)
                pl.BlockSpec((1, 3 * C), lambda i: (0, 0)),    # bqkv
                pl.BlockSpec((C, C), lambda i: (0, 0)),        # Wproj^T (resident)
                pl.BlockSpec((1, C), lambda i: (0, 0)),        # bproj
            ],
            out_specs=pl.BlockSpec((R, C), lambda i: (i, 0)),
        ),
        compiler_params=pltpu.CompilerParams(
            dimension_semantics=("parallel",)),
        cost_estimate=cost,
    )(x2, wqkv_t, bqkv2, wproj_t, bproj2)

    return out2.reshape(B, N, C)


def temporal_attention_ref(x, wqkv, bqkv, wproj, bproj, *, num_heads):
    """Pure-JAX reference mirroring the PyTorch forward (eval mode)."""
    B, N, C = x.shape
    hd = C // num_heads
    scale = float(hd) ** (-0.5)
    qkv = x @ wqkv.T + bqkv                                    # (B, N, 3C)
    qkv = qkv.reshape(B, N, 3, num_heads, hd).transpose(2, 0, 3, 1, 4)
    q, k, v = qkv[0], qkv[1], qkv[2]                           # (B, H, N, hd)
    attn = jnp.einsum('bhnd,bhmd->bhnm', q, k) * scale
    attn = jax.nn.softmax(attn, axis=-1)                       # registered mask is a no-op
    out = jnp.einsum('bhnm,bhmd->bhnd', attn, v)
    out = out.transpose(0, 2, 1, 3).reshape(B, N, C)
    return out @ wproj.T + bproj


if __name__ == "__main__":
    # Small shapes consistent with the module: dim=64, heads=8 (head_dim=8),
    # seq N=8 (<= 64, matching the registered mask buffer), batch B=2.
    B, N, C, H = 2, 8, 64, 8

    key = jax.random.PRNGKey(0)
    kx, kwq, kbq, kwp, kbp = jax.random.split(key, 5)

    x = jax.random.normal(kx, (B, N, C), dtype=jnp.float32)
    wqkv = 0.02 * jax.random.normal(kwq, (3 * C, C), dtype=jnp.float32)
    bqkv = 0.01 * jax.random.normal(kbq, (3 * C,), dtype=jnp.float32)
    wproj = 0.02 * jax.random.normal(kwp, (C, C), dtype=jnp.float32)
    bproj = 0.01 * jax.random.normal(kbp, (C,), dtype=jnp.float32)

    # matmul_dtype=jnp.bfloat16 is the MXU-operand lever for larger N/C (all
    # chips); kept f32 here so the check against the f32 reference stays tight.
    out = temporal_attention(x, wqkv, bqkv, wproj, bproj, num_heads=H)
    out = jax.block_until_ready(out)

    ref = temporal_attention_ref(x, wqkv, bqkv, wproj, bproj, num_heads=H)
    assert out.shape == (B, N, C)
    # 5e-4 tolerance: softmax uses the EUP approx reciprocal (exact division
    # matches the reference to ~1e-6).
    assert jnp.allclose(out, ref, atol=5e-4, rtol=5e-4), "mismatch vs JAX reference"

    print("KERNEL_OK")
</pallas_src>

<mosaic_0001>
module attributes {stable_mosaic.version = 11 : i64} {
  func.func @temporal_attention_kernel(%arg0: i32, %arg1: memref<8x64xf32, #tpu.memory_space<vmem>>, %arg2: memref<64x192xf32, #tpu.memory_space<vmem>>, %arg3: memref<1x192xf32, #tpu.memory_space<vmem>>, %arg4: memref<64x64xf32, #tpu.memory_space<vmem>>, %arg5: memref<1x64xf32, #tpu.memory_space<vmem>>, %arg6: memref<8x64xf32, #tpu.memory_space<vmem>>) attributes {dimension_semantics = [#tpu.dimension_semantics<parallel>], iteration_bounds = array<i64: 2>, scalar_prefetch = 0 : i64, scratch_operands = 0 : i64, tpu.core_type = #tpu.core_type<tc>, window_params = [{transform_indices = @transform_0, window_bounds = array<i64: 8, 64>}, {pipeline_mode = #tpu.pipeline_mode<synchronous>, transform_indices = @transform_1, window_bounds = array<i64: 64, 192>}, {pipeline_mode = #tpu.pipeline_mode<synchronous>, transform_indices = @transform_2, window_bounds = array<i64: 1, 192>}, {pipeline_mode = #tpu.pipeline_mode<synchronous>, transform_indices = @transform_3, window_bounds = array<i64: 64, 64>}, {pipeline_mode = #tpu.pipeline_mode<synchronous>, transform_indices = @transform_4, window_bounds = array<i64: 1, 64>}, {transform_indices = @transform_5, window_bounds = array<i64: 8, 64>}]} {
    %c0 = arith.constant 0 : index
    %c0_0 = arith.constant 0 : index
    %0 = vector.load %arg1[%c0, %c0_0] : memref<8x64xf32, #tpu.memory_space<vmem>>, vector<8x64xf32>
    %c0_1 = arith.constant 0 : index
    %c0_2 = arith.constant 0 : index
    %1 = vector.load %arg2[%c0_1, %c0_2] : memref<64x192xf32, #tpu.memory_space<vmem>>, vector<64x192xf32>
    %cst = arith.constant dense<0.000000e+00> : vector<8x192xf32>
    %2 = tpu.matmul %0, %1, %cst {dimension_numbers = #tpu.dot_dimension_numbers<[1], [0], [0], [1], [0, 0, 1, 1], [], []>} : vector<8x64xf32>, vector<64x192xf32>, vector<8x192xf32> -> vector<8x192xf32>
    %c0_3 = arith.constant 0 : index
    %c0_4 = arith.constant 0 : index
    %3 = vector.load %arg3[%c0_3, %c0_4] : memref<1x192xf32, #tpu.memory_space<vmem>>, vector<1x192xf32>
    %4 = vector.broadcast %3 : vector<1x192xf32> to vector<8x192xf32>
    %5 = arith.addf %2, %4 : vector<8x192xf32>
    %6 = vector.extract_strided_slice %5 {offsets = [0, 0], sizes = [8, 64], strides = [1, 1]} : vector<8x192xf32> to vector<8x64xf32>
    %7 = vector.shape_cast %6 : vector<8x64xf32> to vector<1x8x8x8xf32>
    %8 = tpu.transpose %7, [0, 2, 1, 3] : vector<1x8x8x8xf32> -> vector<1x8x8x8xf32>
    %9 = vector.shape_cast %8 : vector<1x8x8x8xf32> to vector<8x8x8xf32>
    %10 = vector.extract_strided_slice %5 {offsets = [0, 64], sizes = [8, 64], strides = [1, 1]} : vector<8x192xf32> to vector<8x64xf32>
    %11 = vector.shape_cast %10 : vector<8x64xf32> to vector<1x8x8x8xf32>
    %12 = tpu.transpose %11, [0, 2, 1, 3] : vector<1x8x8x8xf32> -> vector<1x8x8x8xf32>
    %13 = vector.shape_cast %12 : vector<1x8x8x8xf32> to vector<8x8x8xf32>
    %14 = vector.extract_strided_slice %5 {offsets = [0, 128], sizes = [8, 64], strides = [1, 1]} : vector<8x192xf32> to vector<8x64xf32>
    %15 = vector.shape_cast %14 : vector<8x64xf32> to vector<1x8x8x8xf32>
    %16 = tpu.transpose %15, [0, 2, 1, 3] : vector<1x8x8x8xf32> -> vector<1x8x8x8xf32>
    %17 = vector.shape_cast %16 : vector<1x8x8x8xf32> to vector<8x8x8xf32>
    "tpu.trace_start"() <{level = 10 : i32, message = "brd,bsd->brs"}> : () -> ()
    %cst_5 = arith.constant dense<0.000000e+00> : vector<8x8x8xf32>
    %18 = tpu.matmul %9, %13, %cst_5 {dimension_numbers = #tpu.dot_dimension_numbers<[2], [2], [1], [1], [0, 0, 0, 1, 1, 1], [0], [0]>} : vector<8x8x8xf32>, vector<8x8x8xf32>, vector<8x8x8xf32> -> vector<8x8x8xf32>
    "tpu.trace_stop"() : () -> ()
    %cst_6 = arith.constant dense<0xFF800000> : vector<8x8xf32>
    %19 = vector.multi_reduction <maximumf>, %18, %cst_6 [2] : vector<8x8x8xf32> to vector<8x8xf32>
    %20 = vector.shape_cast %19 : vector<8x8xf32> to vector<8x8x1xf32>
    %21 = vector.broadcast %20 : vector<8x8x1xf32> to vector<8x8x8xf32>
    %22 = arith.subf %18, %21 : vector<8x8x8xf32>
    %23 = math.exp %22 : vector<8x8x8xf32>
    %cst_7 = arith.constant dense<0.000000e+00> : vector<8x8xf32>
    %24 = vector.multi_reduction <add>, %23, %cst_7 [2] : vector<8x8x8xf32> to vector<8x8xf32>
    %25 = vector.shape_cast %24 : vector<8x8xf32> to vector<8x8x1xf32>
    %26 = tpu.reciprocal %25 {approx = true} : vector<8x8x1xf32> -> vector<8x8x1xf32>
    %27 = vector.broadcast %26 : vector<8x8x1xf32> to vector<8x8x8xf32>
    %28 = arith.mulf %23, %27 : vector<8x8x8xf32>
    "tpu.trace_start"() <{level = 10 : i32, message = "brs,bsd->brd"}> : () -> ()
    %cst_8 = arith.constant dense<0.000000e+00> : vector<8x8x8xf32>
    %29 = tpu.matmul %28, %17, %cst_8 {dimension_numbers = #tpu.dot_dimension_numbers<[2], [1], [1], [2], [0, 0, 0, 1, 1, 2], [0], [0]>} : vector<8x8x8xf32>, vector<8x8x8xf32>, vector<8x8x8xf32> -> vector<8x8x8xf32>
    "tpu.trace_stop"() : () -> ()
    %30 = vector.shape_cast %29 : vector<8x8x8xf32> to vector<1x8x8x8xf32>
    %31 = tpu.transpose %30, [0, 2, 1, 3] : vector<1x8x8x8xf32> -> vector<1x8x8x8xf32>
    %32 = vector.shape_cast %31 : vector<1x8x8x8xf32> to vector<8x64xf32>
    %c0_9 = arith.constant 0 : index
    %c0_10 = arith.constant 0 : index
    %33 = vector.load %arg4[%c0_9, %c0_10] : memref<64x64xf32, #tpu.memory_space<vmem>>, vector<64x64xf32>
    %cst_11 = arith.constant dense<0.000000e+00> : vector<8x64xf32>
    %34 = tpu.matmul %32, %33, %cst_11 {dimension_numbers = #tpu.dot_dimension_numbers<[1], [0], [0], [1], [0, 0, 1, 1], [], []>} : vector<8x64xf32>, vector<64x64xf32>, vector<8x64xf32> -> vector<8x64xf32>
    %c0_12 = arith.constant 0 : index
    %c0_13 = arith.constant 0 : index
    %35 = vector.load %arg5[%c0_12, %c0_13] : memref<1x64xf32, #tpu.memory_space<vmem>>, vector<1x64xf32>
    %36 = vector.broadcast %35 : vector<1x64xf32> to vector<8x64xf32>
    %37 = arith.addf %34, %36 : vector<8x64xf32>
    %c0_14 = arith.constant 0 : index
    %c0_15 = arith.constant 0 : index
    %38 = vector.load %arg6[%c0_14, %c0_15] : memref<8x64xf32, #tpu.memory_space<vmem>>, vector<8x64xf32>
    tpu.vector_store %arg6[%c0_14, %c0_15], %37 {strides = array<i32>} : memref<8x64xf32, #tpu.memory_space<vmem>>, vector<8x64xf32>,
    return
  }
  func.func @transform_0(%arg0: i32) -> (i32, i32) {
    %c0_i32 = arith.constant 0 : i32
    %c0_i32_0 = arith.constant 0 : i32
    return %arg0, %c0_i32 : i32, i32
  }
  func.func @transform_1(%arg0: i32) -> (i32, i32) {
    %c0_i32 = arith.constant 0 : i32
    %c0_i32_0 = arith.constant 0 : i32
    %c0_i32_1 = arith.constant 0 : i32
    return %c0_i32, %c0_i32_0 : i32, i32
  }
  func.func @transform_2(%arg0: i32) -> (i32, i32) {
    %c0_i32 = arith.constant 0 : i32
    %c0_i32_0 = arith.constant 0 : i32
    %c0_i32_1 = arith.constant 0 : i32
    return %c0_i32, %c0_i32_0 : i32, i32
  }
  func.func @transform_3(%arg0: i32) -> (i32, i32) {
    %c0_i32 = arith.constant 0 : i32
    %c0_i32_0 = arith.constant 0 : i32
    %c0_i32_1 = arith.constant 0 : i32
    return %c0_i32, %c0_i32_0 : i32, i32
  }
  func.func @transform_4(%arg0: i32) -> (i32, i32) {
    %c0_i32 = arith.constant 0 : i32
    %c0_i32_0 = arith.constant 0 : i32
    %c0_i32_1 = arith.constant 0 : i32
    return %c0_i32, %c0_i32_0 : i32, i32
  }
  func.func @transform_5(%arg0: i32) -> (i32, i32) {
    %c0_i32 = arith.constant 0 : i32
    %c0_i32_0 = arith.constant 0 : i32
    return %arg0, %c0_i32 : i32, i32
  }
}

</mosaic_0001>

<bundles_post_ra>
// kernel: tpu_custom_call.1
= control target key start
LH: loop header
LB: loop body
LE: loop exit
PB: predicated region body
PF: predicated region fallthrough
CT: control target
= control target key end

     0   :  { %10 = vsyncpa [#allocation3], 0  ;;  %s4243_s0 = inlined_call_operand.hbm [shape: f32[16,64], index: 0, kind: input, shape index: {}]   ;;  %s4244_s1 = inlined_call_operand.hbm [shape: f32[64,192], index: 1, kind: input, shape index: {}]   ;;  %s4245_s2 = inlined_call_operand.vmem [shape: f32[1,192], index: 2, kind: input, shape index: {}]   ;;  %s4246_s3 = inlined_call_operand.hbm [shape: f32[64,64], index: 3, kind: input, shape index: {}]   ;;  %s4247_s4 = inlined_call_operand.vmem [shape: f32[1,64], index: 4, kind: input, shape index: {}]   ;;  %s4248_s5 = inlined_call_operand.hbm [shape: f32[16,64], index: 5, kind: output, shape index: {}]  }
   0x1   :  { %12 = vsyncpa [#allocation3 + $0x1], 0 }
   0x2   :  { %13 = vsyncpa [#allocation6], 0 }
   0x3   :  { %14 = vsyncpa [#allocation4], 0 }
   0x4   :  { %16 = vsyncpa [#allocation4 + $0x1], 0  ;;  %s3625_s18 = smov 0   ;;  %s3627_s19 = smov 0  }
   0x5   :  { %s3629_s20 = smov 0   ;;  %s3631_s21 = smov 0  }
   0x6 LB: > { %s3646_s22 = sadd.s32 4294967295, %s3565_s21   ;;  %s3043_s23 = sadd.s32 4294967294, %s3565_s21   ;;  %s3565_s21 = sphi %s3631_s21, %s4268_s21   ;;  %s3561_s20 = sphi %s3629_s20, %s4267_s20   ;;  %s3557_s19 = sphi %s3627_s19, %s4266_s19   ;;  %s3553_s18 = sphi %s3625_s18, %s4265_s18  }
   0x7   : > { %p42_p0 = scmp.ne.s32.totalorder %s3557_s19, %s3553_s18  ;;  %p4249_p1 = scmp.eq.s32.totalorder %s3646_s22, 0 }
   0x8   : > { %p156_p3 = scmp.eq.s32.totalorder %s3043_s23, 1  ;;  %p3044_p5 = scmp.ge.s32.totalorder %s3565_s21, 1 }
   0x9   : > { %p3655_p4 = por %p4249_p1, %p42_p0  ;;  %p163_p7 = scmp.lt.s32.totalorder %s3565_s21, 3 }
   0xa   : > { %p3660_p6 = por %p156_p3, %p42_p0  ;;  %s3567_s27 = smov [#allocation5]  }
   0xb   : > { %s4252_s24 = scalar_select %p3655_p4, 1, 0 }
   0xc   : > { %s4253_s25 = scalar_select %p3660_p6, 1, 0 }
   0xd   : > { %p3665_p8 = pnand %p3044_p5, %p163_p7  ;;  %s175_s28 = sshll.u32 %s3567_s27, 4  ;;  %s3669_s28 = int_to_ptr.vmem [resolvable:$true] %s175_s28 }
   0xe   : > { %s3568_s30 = smov [#allocation7]   ;;  %s3409_s9 = scalar_lea.hbm %s4244_s1, 2048 }
   0xf   : > { %p3298_p9 = pneg %p3665_p8  ;;  %s191_s6 = sshll.u32 %s3568_s30, 4  ;;  %s3680_s6 = int_to_ptr.vmem [resolvable:$true] %s191_s6 }
  0x10   : > { %p3410_p12 = scmp.ne.s32.totalorder %s4244_s1, %s3409_s9  ;;  %p3416_p5 = scmp.lt.u32.totalorder %s3409_s9, %s4244_s1 }
  0x11   : > { %p3676_p11 = pnand %p3298_p9, %p4249_p1 }
  0x13   : > { %p3411_p13 = pneg %p3676_p11 }
  0x15   : > { %p3412_p0 = pnand %p3411_p13, %p3410_p12 }
  0x17   : > { %p3413_p3 = pneg %p3412_p0 }
  0x19   : > { %p3418_p7 = pnand %p3416_p5, %p3413_p3 }
  0x1b   : > { %3421 = shalt.err (!%p3418_p7)
}
  0x1c   : > { %s3422_s14 = scalar_lea.vmem %s3669_s28, 2048  ;;  %p3430_p2 = scmp.lt.s32.totalorder %s3669_s28, %s3669_s28 }
  0x1d   : > { %p3423_p9 = scmp.ne.s32.totalorder %s3669_s28, %s3422_s14  ;;  %p3431_p12 = scmp.lt.s32.totalorder %s3422_s14, %s3422_s14 }
  0x1f   : > { %p3425_p10 = pnand %p3423_p9, %p3411_p13  ;;  %p3432_p0 = por %p3431_p12, %p3430_p2 }
  0x21   : > { %p3426_p1 = pneg %p3425_p10 }
  0x23   : > { %p3433_p6 = pnand %p3432_p0, %p3426_p1 }
  0x25   : > { %3436 = shalt.err (!%p3433_p6)
}
  0x26   : > { %s3569_s15 = smov 256   ;;  %s3570_s16 = smov 16  }
  0x27   : > { %3301 = dma.hbm_to_vmem [thread:$0]  (!%p3676_p11), %s4244_s1, 2048, %s3669_s28, [#allocation6], %s3569_s15, %s3569_s15, %s3570_s16  }
  0x28   : > { %s3437_s7 = scalar_lea.hbm %s4246_s3, 1024 }
  0x29   : > { %p3438_p2 = scmp.ne.s32.totalorder %s4246_s3, %s3437_s7  ;;  %p3444_p10 = scmp.lt.u32.totalorder %s3437_s7, %s4246_s3 }
  0x2b   : > { %p3440_p1 = pnand %p3438_p2, %p3411_p13 }
  0x2d   : > { %p3441_p6 = pneg %p3440_p1 }
  0x2f   : > { %p3446_p3 = pnand %p3444_p10, %p3441_p6 }
  0x31   : > { %3449 = shalt.err (!%p3446_p3)
}
  0x32   : > { %s3450_s28 = scalar_lea.vmem %s3680_s6, 1024  ;;  %p3458_p12 = scmp.lt.s32.totalorder %s3680_s6, %s3680_s6 }
  0x33   : > { %p3451_p5 = scmp.ne.s32.totalorder %s3680_s6, %s3450_s28  ;;  %p3459_p0 = scmp.lt.s32.totalorder %s3450_s28, %s3450_s28 }
  0x35   : > { %p3453_p7 = pnand %p3451_p5, %p3411_p13  ;;  %p3460_p2 = por %p3459_p0, %p3458_p12 }
  0x37   : > { %p3454_p9 = pneg %p3453_p7 }
  0x39   : > { %p3461_p1 = pnand %p3460_p2, %p3454_p9 }
  0x3b   : > { %3464 = shalt.err (!%p3461_p1)
}
  0x3c   : > { %s3571_s12 = smov 128   ;;  %s3572_s13 = smov 8  }
  0x3d   : > { %3304 = dma.hbm_to_vmem [thread:$0]  (!%p3676_p11), %s4246_s3, 1024, %s3680_s6, [#allocation6], %s3571_s12, %s3571_s12, %s3572_s13  }
  0x3e   : > { %s3735_s16 = sadd.s32 1, %s3565_s21   ;;  %s29_s23 = sadd.s32 1, %s3561_s20 }
  0x3f   : > { %s26_s17 = ssub.s32 %s3565_s21, %s3735_s16  ;;  %p36_p6 = scmp.ne.s32.totalorder %s3561_s20, %s3557_s19 }
  0x40   : > { %p27_p13 = scmp.eq.s32.totalorder %s26_s17, 0  ;;  %p37_p10 = scmp.eq.s32.totalorder %s3565_s21, 0 }
  0x41   : > { %p4256_p5 = scmp.eq.s32.totalorder %s3646_s22, 1  ;;  %p3315_p9 = scmp.lt.s32.totalorder %s3565_s21, 2 }
  0x42   : > { %s3744_s27 = scalar_select %p27_p13, %s3561_s20, %s29_s23  }
  0x43   : > { %p38_p3 = por %p37_p10, %p36_p6  ;;  %p3748_p7 = por %p4256_p5, %p36_p6 }
  0x44   : > { %s208_s29 = sand.u32 1, %s3561_s20   ;;  %s3049_s6 = sshll.u32 %s3565_s21, 7 }
  0x45   : > { %s4257_s30 = scalar_select %p3748_p7, 1, 0 }
  0x46   : > { %s3048_s7 = sshll.u32 %s208_s29, 3  ;;  %s3758_s10 = scalar_lea.hbm %s4243_s0, %s3049_s6 }
  0x47   : > { %s212_s11 = scalar_lea.vmem [#allocation2], %s3048_s7  ;;  %p3762_p11 = pnand %p3315_p9, %p38_p3 }
  0x48   : > { %s219_s28 = sshll.u32 %s212_s11, 4  ;;  %s209_s13 = scalar_lea.sflag [#allocation3], %s208_s29  ;;  %s3760_s28 = int_to_ptr.vmem [resolvable:$true] %s219_s28 }
  0x49   : > { %s3465_s14 = scalar_lea.hbm %s3758_s10, 128  ;;  %p3467_p0 = pneg %p3762_p11 }
  0x4a   : > { %p3466_p12 = scmp.ne.s32.totalorder %s3758_s10, %s3465_s14  ;;  %s3470_s23 = scalar_lea.hbm %s4243_s0, 256 }
  0x4b   : > { %p3471_p13 = scmp.lt.u32.totalorder %s3758_s10, %s4243_s0  ;;  %p3472_p6 = scmp.lt.u32.totalorder %s3470_s23, %s3465_s14 }
  0x4c   : > { %p3468_p2 = pnand %p3467_p0, %p3466_p12  ;;  %p3474_p3 = scmp.lt.u32.totalorder %s3465_s14, %s3758_s10 }
  0x4d   : > { %p3473_p10 = por %p3472_p6, %p3471_p13 }
  0x4e   : > { %p3469_p1 = pneg %p3468_p2 }
  0x4f   : > { %p3475_p5 = por %p3474_p3, %p3473_p10 }
  0x51   : > { %p3476_p9 = pnand %p3475_p5, %p3469_p1 }
  0x53   : > { %3479 = shalt.err (!%p3476_p9)
}
  0x54   : > { %s3480_s29 = scalar_lea.vmem %s3760_s28, 128  ;;  %s3573_s8 = smov [#allocation2]  }
  0x55   : > { %p3481_p12 = scmp.ne.s32.totalorder %s3760_s28, %s3480_s29  ;;  %s3485_s9 = sshll.u32 %s3573_s8, 4  ;;  %s3486_s9 = int_to_ptr.vmem [resolvable:$false] %s3485_s9 }
  0x56   : > { %s3487_s11 = scalar_lea.vmem %s3486_s9, 256  ;;  %p3488_p4 = scmp.lt.s32.totalorder %s3760_s28, %s3486_s9 }
  0x57   : > { %p3483_p2 = pnand %p3481_p12, %p3467_p0  ;;  %p3489_p13 = scmp.lt.s32.totalorder %s3487_s11, %s3480_s29 }
  0x59   : > { %p3484_p7 = pneg %p3483_p2  ;;  %p3490_p6 = por %p3489_p13, %p3488_p4 }
  0x5b   : > { %p3491_p10 = pnand %p3490_p6, %p3484_p7 }
  0x5d   : > { %3494 = shalt.err (!%p3491_p10)
}
  0x5e   : > { %3308 = dma.hbm_to_vmem [thread:$0]  (!%p3762_p11), %s3758_s10, 128, %s3760_s28, %s209_s13  }
  0x5f   : > { %228 = sbr.rel (%p3665_p8) target bundleno = 1790 (0x6fe), region = 40  ;;  %s3794_s14 = sand.u32 (!%p3665_p8), 1, %s3557_s19  }
  0x60   : > { %s3051_s15 = sshll.u32 (!%p3665_p8), %s3794_s14, 3  ;;  %s231_s17 = scalar_lea.sflag (!%p3665_p8), [#allocation3], %s3794_s14 }
  0x61   : > { %s3800_s23 = scalar_lea.vmem (!%p3665_p8), [#allocation2], %s3051_s15  ;;  %p4259_p4 = scmp.ne.s32.totalorder (!%p3665_p8), %s4252_s24, 0 }
  0x66   : > { %3540 = dma.done.wait (%p4259_p4), %s231_s17, 128  }
  0x67   : > { %3542 = vsyncadd (%p4259_p4), %s231_s17, 4294967168  ;;  %p4260_p7 = scmp.eq.s32.totalorder %s3646_s22, 0 }
  0x69   : > { %3544 = dma.done.wait (%p4260_p7), [#allocation6], 3072   ;;  %p4261_p8 = pmov %p4260_p7 }
  0x6a   : > { %v3574_v0 = vmov 0.0   ;;  %v271_v1 = vld [vmem:[#allocation5 + $0x8] sm:$0xff]  ;;  %v273_v2 = vld [vmem:[#allocation5 + $0x18] sm:$0xff]  ;;  %v270_v3 = vld [vmem:[#allocation5] sm:$0xff]  ;;  %vm298_vm0 = vcmask 523264   ;;  %v288_v26 = vlaneseq  ;;  %s3575_s10 = smov 104  }
  0x6b   : > { %3546 = vsyncadd (%p4261_p8), [#allocation6], 4294964224  ;;  %366 = vmatprep.mubr.f32.mxu0 %v3574_v0  ;;  %3159 = vmatprep.subr.mxu1 %v3574_v0  ;;  %v3258_v4 = vpack.c.bf16 %v273_v2, %v271_v1  ;;  %v272_v5 = vld [vmem:[#allocation5 + $0x10] sm:$0xff]  ;;  %v275_v6 = vld [vmem:[#allocation5 + $0x28] sm:$0xff]  ;;  %s3576_s28 = smov 120   ;;  %s3577_s12 = smov 96  }
  0x6c   : > { %v277_v7 = vld [vmem:[#allocation5 + $0x38] sm:$0xff]  ;;  %v3260_v8 = vpack.c.bf16 %v272_v5, %v270_v3  ;;  %v274_v10 = vld [vmem:[#allocation5 + $0x20] sm:$0xff]  ;;  %v276_v11 = vld [vmem:[#allocation5 + $0x30] sm:$0xff]  ;;  %v3815_v27 = vshrl.u32 %v288_v26, 7  ;;  %s3578_s13 = smov 112   ;;  %s3579_s7 = smov 80  }
  0x6d   : > { %v3262_v9 = vpack.c.bf16 %v277_v7, %v275_v6  ;;  %v279_v12 = vld [vmem:[#allocation5 + $0x48] sm:$0xff]  ;;  %3259 = vmatprep.subr.bf16.mxu0 %v3258_v4  ;;  %v281_v13 = vld [vmem:[#allocation5 + $0x58] sm:$0xff]  ;;  %v3264_v14 = vpack.c.bf16 %v276_v11, %v274_v10  ;;  %v278_v16 = vld [vmem:[#allocation5 + $0x40] sm:$0xff]  ;;  %s3580_s6 = smov 88   ;;  %s3581_s29 = smov 64   ;;  %vm3585_vm1 = vmmov 0  }
  0x6e   : > { %3261 = vmatpush1.bf16.msra.mxu0 %v3260_v8  ;;  %v3266_v15 = vpack.c.bf16 %v281_v13, %v279_v12  ;;  %v280_v17 = vld [vmem:[#allocation5 + $0x50] sm:$0xff]  ;;  %v283_v18 = vld [vmem:[#allocation5 + $0x68] sm:$0xff]  ;;  %v285_v19 = vld [vmem:[#allocation5 + $0x78] sm:$0xff]  ;;  %v290_v28 = vsub.s32 0, %v3815_v27  ;;  %s3582_s8 = smov 72   ;;  %3161 = vmatprep.mubr.msk.f32.mxu1 %vm3585_vm1, %v3574_v0  ;;  %vm1257_vm2 = vcmask 64512  }
  0x6f   : > { %3263 = vmatprep.subr.bf16.mxu0 %v3262_v9  ;;  %v3268_v20 = vpack.c.bf16 %v280_v17, %v278_v16  ;;  %v3270_v21 = vpack.c.bf16 %v285_v19, %v283_v18  ;;  %v282_v22 = vld [vmem:[#allocation5 + $0x60] sm:$0xff]  ;;  %v284_v23 = vld [vmem:[#allocation5 + $0x70] sm:$0xff]  ;;  %v3583_v34 = vmov 1983009808   ;;  %v3584_v36 = vmov 1934713408  }
  0x70   : > { %v3272_v24 = vpack.c.bf16 %v284_v23, %v282_v22  ;;  %v269_v25 = vld [vmem:[%s3800_s23] sm:$0xff]  ;;  %v398_v35 = vunpack.c.l.s4 %v3583_v34  ;;  %v462_v37 = vunpack.c.l.s4 %v3584_v36  ;;  %s3587_s9 = smov 16   ;;  %s3588_s11 = smov 8   ;;  %vm2839_vm3 = vcmask 130048  }
  0x71   : > { %v3821_v29 = vld [vmem:[%s4245_s2] sm:$0x3]  ;;  %s3589_s17 = smov 24   ;;  %s3590_s23 = smov 40   ;;  %vm2841_vm4 = vcmask 195584   ;;  %vm2843_vm5 = vcmask 261120  }
  0x72   : > { %3265 = vmatpush1.bf16.msra.mxu0 %v3264_v14  ;;  %v291_v30 = vrot.slane %v3821_v29, %v290_v28  ;;  %v399_v38 = vunpack.c.0.s8 %v398_v35  ;;  %v463_v43 = vunpack.c.0.s8 %v462_v37  ;;  %s3591_s24 = smov 32   ;;  %s3592_s26 = smov 56   ;;  %vm2845_vm6 = vcmask 326656  }
  0x73   : > { %3267 = vmatprep.subr.bf16.mxu0 %v3266_v15  ;;  %vm2847_vm7 = vcmask 392192   ;;  %vm2849_vm8 = vcmask 457728   ;;  %p4262_p0 = scmp.ne.s32.totalorder %s4257_s30, 0 }
  0x74   : > { %v3836_v44 = vsub.s32 %v399_v38, %v3815_v27  ;;  %v3841_v49 = vsub.s32 %v463_v43, %v3815_v27 }
  0x76   : > { %3269 = vmatpush1.bf16.msra.mxu0 %v3268_v20 }
  0x77   : > { %3271 = vmatprep.subr.bf16.mxu0 %v3270_v21 }
  0x7a   : > { %3273 = vmatpush1.bf16.msra.mxu0 %v3272_v24 }
  0x7b   : > { %3199 = vmatprep.subr.mxu0 %v3574_v0 }
  0x7d   : > { %3055 = vmatmul.mubr.msk.f32.vlgmr.msra.gmra.mrb[0].mxu0 %vm298_vm0, %v269_v25 }
  0x7e   : > { %3201 = vmatprep.mubr.msk.f32.mxu0 %vm3585_vm1, %v3574_v0 }
 0x150   : > { %v368_v31 = vpop.f32.mrb[0].mxu0 }
 0x151   : > { %v369_v32 = vadd.f32 %v368_v31, %v291_v30  ;;  %v3824_v33 = vpop.f32.mrb[1].mxu0 }
 0x153   : > { %380 = vrot.lane.b32.xlu1 %v369_v32, %s3575_s10  ;;  %374 = vrot.lane.b32.xlu0 %v369_v32, %s3576_s28 }
 0x157   : > { %383 = vrot.lane.b32.xlu1 %v369_v32, %s3577_s12  ;;  %377 = vrot.lane.b32.xlu0 %v369_v32, %s3578_s13 }
 0x15b   : > { %389 = vrot.lane.b32.xlu1 %v369_v32, %s3579_s7  ;;  %386 = vrot.lane.b32.xlu0 %v369_v32, %s3580_s6 }
 0x15f   : > { %667 = vrot.lane.b32.xlu1 %v369_v32, %s3581_s29  ;;  %392 = vrot.lane.b32.xlu0 %v369_v32, %s3582_s8 }
 0x1c5   : > { %v381_v39 = vpop.permute.xlu1 %380  ;;  %v375_v40 = vpop.permute.xlu0 %374 }
 0x1c6   : > { %v411_v41 = vcombine.low %v375_v40, %v381_v39  ;;  %v412_v42 = vcombine.high %v375_v40, %v381_v39  ;;  %669 = vrot.lane.b32.xlu0 %v375_v40, %s3581_s29 }
 0x1c8   : > { %v419_v50 = vrot.slane %v411_v41, %v3836_v44  ;;  %v426_v51 = vrot.slane %v412_v42, %v3836_v44 }
 0x1c9   : > { %v384_v45 = vpop.permute.xlu1 %383  ;;  %v378_v46 = vpop.permute.xlu0 %377 }
 0x1ca   : > { %v395_v47 = vcombine.low %v369_v32, %v378_v46  ;;  %v396_v48 = vcombine.high %v369_v32, %v378_v46  ;;  %673 = vrot.lane.b32.xlu0 %v381_v39, %s3581_s29  ;;  %671 = vrot.lane.b32.xlu1 %v378_v46, %s3581_s29 }
 0x1cc   : > { %v403_v52 = vrot.slane %v395_v47, %v3836_v44  ;;  %v410_v53 = vrot.slane %v396_v48, %v3836_v44 }
 0x1cd   : > { %v390_v54 = vpop.permute.xlu1 %389  ;;  %v387_v55 = vpop.permute.xlu0 %386 }
 0x1ce   : > { %v459_v56 = vcombine.low %v403_v52, %v419_v50  ;;  %v460_v57 = vcombine.high %v403_v52, %v419_v50  ;;  %v475_v58 = vcombine.low %v410_v53, %v426_v51  ;;  %v476_v59 = vcombine.high %v410_v53, %v426_v51  ;;  %675 = vrot.lane.b32.xlu1 %v384_v45, %s3581_s29 }
 0x1cf   : > { %v427_v60 = vcombine.low %v384_v45, %v390_v54  ;;  %v428_v61 = vcombine.high %v384_v45, %v390_v54  ;;  %677 = vrot.lane.b32.xlu0 %v387_v55, %s3581_s29 }
 0x1d0   : > { %v467_v62 = vrot.slane %v459_v56, %v3841_v49  ;;  %v474_v63 = vrot.slane %v460_v57, %v3841_v49  ;;  %v483_v1 = vrot.slane %v475_v58, %v3841_v49  ;;  %v490_v2 = vrot.slane %v476_v59, %v3841_v49 }
 0x1d1   : > { %v393_v3 = vpop.permute.xlu0 %392  ;;  %v435_v14 = vrot.slane %v427_v60, %v3836_v44  ;;  %v442_v15 = vrot.slane %v428_v61, %v3836_v44 }
 0x1d2   : > { %v3056_v4 = vcombine.low %v467_v62, %v474_v63  ;;  %v3058_v5 = vcombine.high %v467_v62, %v474_v63  ;;  %v3060_v6 = vcombine.low %v483_v1, %v490_v2  ;;  %v3062_v7 = vcombine.high %v483_v1, %v490_v2  ;;  %679 = vrot.lane.b32.xlu1 %v390_v54, %s3581_s29  ;;  %v668_v63 = vpop.permute.xlu1 %667 }
 0x1d3   : > { %v443_v8 = vcombine.low %v387_v55, %v393_v3  ;;  %v444_v9 = vcombine.high %v387_v55, %v393_v3  ;;  %681 = vrot.lane.b32.xlu0 %v393_v3, %s3581_s29 }
 0x1d4   : > { %v539_v10 = vrot.slane %v3056_v4, %v3836_v44  ;;  %v555_v11 = vrot.slane %v3058_v5, %v3836_v44  ;;  %v571_v12 = vrot.slane %v3060_v6, %v3836_v44  ;;  %v587_v13 = vrot.slane %v3062_v7, %v3836_v44 }
 0x1d5   : > { %v451_v16 = vrot.slane %v443_v8, %v3836_v44  ;;  %v458_v17 = vrot.slane %v444_v9, %v3836_v44 }
 0x1d6   : > { %v595_v18 = vcombine.low %v539_v10, %v555_v11  ;;  %v596_v19 = vcombine.high %v539_v10, %v555_v11  ;;  %v627_v20 = vcombine.low %v571_v12, %v587_v13  ;;  %v628_v21 = vcombine.high %v571_v12, %v587_v13 }
 0x1d7   : > { %v491_v22 = vcombine.low %v435_v14, %v451_v16  ;;  %v492_v23 = vcombine.high %v435_v14, %v451_v16  ;;  %v507_v24 = vcombine.low %v442_v15, %v458_v17  ;;  %v508_v25 = vcombine.high %v442_v15, %v458_v17 }
 0x1d8   : > { %v3868_v26 = vrot.slane %v595_v18, %v3841_v49  ;;  %v3871_v28 = vrot.slane %v627_v20, %v3841_v49  ;;  %v3874_v30 = vrot.slane %v596_v19, %v3841_v49  ;;  %v3877_v31 = vrot.slane %v628_v21, %v3841_v49 }
 0x1d9   : > { %v499_v32 = vrot.slane %v491_v22, %v3841_v49  ;;  %v506_v34 = vrot.slane %v492_v23, %v3841_v49  ;;  %v515_v35 = vrot.slane %v507_v24, %v3841_v49  ;;  %v522_v36 = vrot.slane %v508_v25, %v3841_v49 }
 0x1da   : > { %v659_v37 = vcombine.low %v3868_v26, %v3871_v28  ;;  %v660_v38 = vcombine.high %v3868_v26, %v3871_v28  ;;  %v661_v39 = vcombine.low %v3874_v30, %v3877_v31  ;;  %v662_v40 = vcombine.high %v3874_v30, %v3877_v31 }
 0x1db   : > { %v3057_v41 = vcombine.low %v499_v32, %v506_v34  ;;  %v3059_v42 = vcombine.high %v499_v32, %v506_v34  ;;  %v3061_v43 = vcombine.low %v515_v35, %v522_v36  ;;  %v3063_v45 = vcombine.high %v515_v35, %v522_v36 }
 0x1dd   : > { %v546_v46 = vrot.slane %v3057_v41, %v3836_v44  ;;  %v562_v47 = vrot.slane %v3059_v42, %v3836_v44  ;;  %v578_v48 = vrot.slane %v3061_v43, %v3836_v44  ;;  %v594_v50 = vrot.slane %v3063_v45, %v3836_v44 }
 0x1df   : > { %v611_v51 = vcombine.low %v546_v46, %v562_v47  ;;  %v612_v52 = vcombine.high %v546_v46, %v562_v47  ;;  %v643_v53 = vcombine.low %v578_v48, %v594_v50  ;;  %v644_v54 = vcombine.high %v578_v48, %v594_v50 }
 0x1e1   : > { %v3896_v55 = vrot.slane %v611_v51, %v3841_v49  ;;  %v3899_v56 = vrot.slane %v643_v53, %v3841_v49  ;;  %v3902_v57 = vrot.slane %v612_v52, %v3841_v49  ;;  %v3905_v58 = vrot.slane %v644_v54, %v3841_v49 }
 0x1e3   : > { %v663_v59 = vcombine.low %v3896_v55, %v3899_v56  ;;  %v664_v60 = vcombine.high %v3896_v55, %v3899_v56  ;;  %v665_v61 = vcombine.low %v3902_v57, %v3905_v58  ;;  %v666_v62 = vcombine.high %v3902_v57, %v3905_v58 }
 0x238   : > { %v670_v1 = vpop.permute.xlu0 %669 }
 0x23c   : > { %v672_v2 = vpop.permute.xlu1 %671  ;;  %v674_v3 = vpop.permute.xlu0 %673 }
 0x23d   : > { %v691_v4 = vcombine.low %v668_v63, %v672_v2  ;;  %v692_v5 = vcombine.high %v668_v63, %v672_v2  ;;  %v707_v6 = vcombine.low %v670_v1, %v674_v3  ;;  %v708_v7 = vcombine.high %v670_v1, %v674_v3 }
 0x23f   : > { %v699_v8 = vrot.slane %v691_v4, %v3836_v44  ;;  %v706_v9 = vrot.slane %v692_v5, %v3836_v44  ;;  %v715_v10 = vrot.slane %v707_v6, %v3836_v44  ;;  %v722_v11 = vrot.slane %v708_v7, %v3836_v44 }
 0x240   : > { %v676_v12 = vpop.permute.xlu1 %675 }
 0x241   : > { %v755_v13 = vcombine.low %v699_v8, %v715_v10  ;;  %v756_v14 = vcombine.high %v699_v8, %v715_v10  ;;  %v771_v15 = vcombine.low %v706_v9, %v722_v11  ;;  %v772_v16 = vcombine.high %v706_v9, %v722_v11  ;;  %v678_v17 = vpop.permute.xlu0 %677 }
 0x243   : > { %v763_v18 = vrot.slane %v755_v13, %v3841_v49  ;;  %v770_v19 = vrot.slane %v756_v14, %v3841_v49  ;;  %v779_v20 = vrot.slane %v771_v15, %v3841_v49  ;;  %v786_v21 = vrot.slane %v772_v16, %v3841_v49 }
 0x244   : > { %v680_v22 = vpop.permute.xlu1 %679 }
 0x245   : > { %v3064_v23 = vcombine.low %v763_v18, %v770_v19  ;;  %v3066_v24 = vcombine.high %v763_v18, %v770_v19  ;;  %v3068_v25 = vcombine.low %v779_v20, %v786_v21  ;;  %v3070_v32 = vcombine.high %v779_v20, %v786_v21  ;;  %v682_v34 = vpop.permute.xlu0 %681 }
 0x246   : > { %v723_v35 = vcombine.low %v676_v12, %v680_v22  ;;  %v724_v36 = vcombine.high %v676_v12, %v680_v22  ;;  %v739_v41 = vcombine.low %v678_v17, %v682_v34  ;;  %v740_v42 = vcombine.high %v678_v17, %v682_v34 }
 0x247   : > { %v835_v43 = vrot.slane %v3064_v23, %v3836_v44  ;;  %v851_v45 = vrot.slane %v3066_v24, %v3836_v44  ;;  %v867_v46 = vrot.slane %v3068_v25, %v3836_v44  ;;  %v883_v47 = vrot.slane %v3070_v32, %v3836_v44 }
 0x248   : > { %v731_v48 = vrot.slane %v723_v35, %v3836_v44  ;;  %v738_v50 = vrot.slane %v724_v36, %v3836_v44  ;;  %v747_v51 = vrot.slane %v739_v41, %v3836_v44  ;;  %v754_v52 = vrot.slane %v740_v42, %v3836_v44 }
 0x249   : > { %v891_v53 = vcombine.low %v835_v43, %v851_v45  ;;  %v923_v54 = vcombine.low %v867_v46, %v883_v47  ;;  %v892_v4 = vcombine.high %v835_v43, %v851_v45  ;;  %v924_v6 = vcombine.high %v867_v46, %v883_v47 }
 0x24a   : > { %v787_v63 = vcombine.low %v731_v48, %v747_v51  ;;  %v788_v1 = vcombine.high %v731_v48, %v747_v51  ;;  %v803_v2 = vcombine.low %v738_v50, %v754_v52  ;;  %v804_v3 = vcombine.high %v738_v50, %v754_v52 }
 0x24b   : > { %v899_v5 = vrot.slane %v891_v53, %v3841_v49  ;;  %v931_v7 = vrot.slane %v923_v54, %v3841_v49  ;;  %v906_v18 = vrot.slane %v892_v4, %v3841_v49  ;;  %v938_v19 = vrot.slane %v924_v6, %v3841_v49 }
 0x24c   : > { %v795_v8 = vrot.slane %v787_v63, %v3841_v49  ;;  %v802_v9 = vrot.slane %v788_v1, %v3841_v49  ;;  %v811_v10 = vrot.slane %v803_v2, %v3841_v49  ;;  %v818_v11 = vrot.slane %v804_v3, %v3841_v49 }
 0x24d   : > { %v955_v12 = vcombine.low %v899_v5, %v931_v7  ;;  %v956_v17 = vcombine.high %v899_v5, %v931_v7  ;;  %v957_v32 = vcombine.low %v906_v18, %v938_v19  ;;  %v294_v2 = vsub.s32 1, %v3815_v27 }
 0x24e   : > { %v3065_v13 = vcombine.low %v795_v8, %v802_v9  ;;  %v3067_v14 = vcombine.high %v795_v8, %v802_v9  ;;  %v3069_v15 = vcombine.low %v811_v10, %v818_v11  ;;  %v3071_v16 = vcombine.high %v811_v10, %v818_v11 }
 0x24f   : > { %3160 = vmatpush3.xpose.msk.msra.mxu1 %vm1257_vm2, %v955_v12  ;;  %v295_v4 = vrot.slane %v3821_v29, %v294_v2 }
 0x250   : > { %3164 = vmatprep.subr.mxu1 %v3574_v0  ;;  %v842_v20 = vrot.slane %v3065_v13, %v3836_v44  ;;  %v858_v21 = vrot.slane %v3067_v14, %v3836_v44  ;;  %v874_v22 = vrot.slane %v3069_v15, %v3836_v44  ;;  %v890_v23 = vrot.slane %v3071_v16, %v3836_v44 }
 0x251   : > { %v4023_v5 = vadd.f32 %v3824_v33, %v295_v4 }
 0x252   : > { %3162 = vmatmul.mubr.msk.f32.vlgmr.msra.gmra.mrb[0].mxu1 %vm1257_vm2, %v659_v37  ;;  %v907_v24 = vcombine.low %v842_v20, %v858_v21  ;;  %v939_v25 = vcombine.low %v874_v22, %v890_v23  ;;  %v958_v37 = vcombine.high %v906_v18, %v938_v19  ;;  %v908_v26 = vcombine.high %v842_v20, %v858_v21 }
 0x253   : > { %3165 = vmatpush3.xpose.msk.msra.mxu1 %vm1257_vm2, %v956_v17  ;;  %3166 = vmatprep.mubr.msk.f32.mxu1 %vm3585_vm1, %v3574_v0  ;;  %v940_v28 = vcombine.high %v874_v22, %v890_v23 }
 0x254   : > { %3169 = vmatprep.subr.mxu1 %v3574_v0  ;;  %v915_v34 = vrot.slane %v907_v24, %v3841_v49  ;;  %v947_v35 = vrot.slane %v939_v25, %v3841_v49  ;;  %v922_v36 = vrot.slane %v908_v26, %v3841_v49 }
 0x255   : > { %v954_v41 = vrot.slane %v940_v28, %v3841_v49 }
 0x256   : > { %3167 = vmatmul.mubr.msk.f32.vlgmr.msra.gmra.mrb[2].mxu1 %vm1257_vm2, %v660_v38  ;;  %v959_v38 = vcombine.low %v915_v34, %v947_v35 }
 0x257   : > { %3170 = vmatpush3.xpose.msk.msra.mxu1 %vm1257_vm2, %v957_v32  ;;  %3171 = vmatprep.mubr.msk.f32.mxu1 %vm3585_vm1, %v3574_v0  ;;  %v961_v30 = vcombine.low %v922_v36, %v954_v41  ;;  %v962_v31 = vcombine.high %v922_v36, %v954_v41 }
 0x258   : > { %3174 = vmatprep.subr.mxu1 %v3574_v0 }
 0x25a   : > { %3172 = vmatmul.mubr.msk.f32.vlgmr.msra.gmra.mrb[4].mxu1 %vm1257_vm2, %v661_v39  ;;  %v960_v39 = vcombine.high %v915_v34, %v947_v35 }
 0x25b   : > { %3175 = vmatpush3.xpose.msk.msra.mxu1 %vm1257_vm2, %v958_v37  ;;  %3176 = vmatprep.mubr.msk.f32.mxu1 %vm3585_vm1, %v3574_v0 }
 0x25c   : > { %3179 = vmatprep.subr.mxu1 %v3574_v0 }
 0x25e   : > { %3177 = vmatmul.mubr.msk.f32.vlgmr.msra.gmra.mrb[6].mxu1 %vm1257_vm2, %v662_v40 }
 0x25f   : > { %3180 = vmatpush3.xpose.msk.msra.mxu1 %vm1257_vm2, %v959_v38  ;;  %3181 = vmatprep.mubr.msk.f32.mxu1 %vm3585_vm1, %v3574_v0 }
 0x260   : > { %3184 = vmatprep.subr.mxu1 %v3574_v0 }
 0x262   : > { %3182 = vmatmul.mubr.msk.f32.vlgmr.msra.gmra.mrb[8].mxu1 %vm1257_vm2, %v663_v59 }
 0x263   : > { %3185 = vmatpush3.xpose.msk.msra.mxu1 %vm1257_vm2, %v960_v39  ;;  %3186 = vmatprep.mubr.msk.f32.mxu1 %vm3585_vm1, %v3574_v0 }
 0x264   : > { %3189 = vmatprep.subr.mxu1 %v3574_v0 }
 0x266   : > { %3187 = vmatmul.mubr.msk.f32.vlgmr.msra.gmra.mrb[10].mxu1 %vm1257_vm2, %v664_v60 }
 0x267   : > { %3190 = vmatpush3.xpose.msk.msra.mxu1 %vm1257_vm2, %v961_v30  ;;  %3191 = vmatprep.mubr.msk.f32.mxu1 %vm3585_vm1, %v3574_v0 }
 0x268   : > { %3194 = vmatprep.subr.mxu1 %v3574_v0 }
 0x26a   : > { %3192 = vmatmul.mubr.msk.f32.vlgmr.msra.gmra.mrb[12].mxu1 %vm1257_vm2, %v665_v61 }
 0x26b   : > { %3195 = vmatpush3.xpose.msk.msra.mxu1 %vm1257_vm2, %v962_v31  ;;  %3196 = vmatprep.mubr.msk.f32.mxu1 %vm3585_vm1, %v3574_v0 }
 0x26c   : > { %3204 = vmatprep.subr.mxu1 %v3574_v0 }
 0x26e   : > { %3197 = vmatmul.mubr.msk.f32.vlgmr.msra.gmra.mrb[14].mxu1 %vm1257_vm2, %v666_v62 }
 0x26f   : > { %3206 = vmatprep.mubr.msk.f32.mxu1 %vm3585_vm1, %v3574_v0 }
 0x325   : > { %v1330_v40 = vpop.f32.mrb[0].mxu1 }
 0x326   : > { %v3163_v55 = vpop.f32.mrb[1].mxu1  ;;  %v1866_v56 = vsel %vm1257_vm2, %v1330_v40, -inf }
 0x327   : > { %1867 = vmax.xlane.f32.xlu1 %v1866_v56 }
 0x329   : > { %v1406_v59 = vpop.f32.mrb[2].mxu1 }
 0x32a   : > { %v3168_v60 = vpop.f32.mrb[3].mxu1  ;;  %v1869_v61 = vsel %vm1257_vm2, %v1406_v59, -inf }
 0x32b   : > { %1870 = vmax.xlane.f32.xlu0 %v1869_v61 }
 0x32d   : > { %v1482_v42 = vpop.f32.mrb[4].mxu1 }
 0x32e   : > { %v3173_v43 = vpop.f32.mrb[5].mxu1  ;;  %v1872_v45 = vsel %vm1257_vm2, %v1482_v42, -inf }
 0x32f   : > { %1873 = vmax.xlane.f32.xlu0 %v1872_v45 }
 0x331   : > { %v1558_v57 = vpop.f32.mrb[6].mxu1 }
 0x332   : > { %v3178_v58 = vpop.f32.mrb[7].mxu1  ;;  %v1875_v62 = vsel %vm1257_vm2, %v1558_v57, -inf }
 0x333   : > { %1876 = vmax.xlane.f32.xlu1 %v1875_v62 }
 0x335   : > { %v1634_v46 = vpop.f32.mrb[8].mxu1 }
 0x336   : > { %v3183_v47 = vpop.f32.mrb[9].mxu1  ;;  %v1878_v48 = vsel %vm1257_vm2, %v1634_v46, -inf }
 0x337   : > { %1879 = vmax.xlane.f32.xlu0 %v1878_v48 }
 0x339   : > { %v1710_v50 = vpop.f32.mrb[10].mxu1 }
 0x33a   : > { %v3188_v51 = vpop.f32.mrb[11].mxu1  ;;  %v1881_v52 = vsel %vm1257_vm2, %v1710_v50, -inf }
 0x33b   : > { %1882 = vmax.xlane.f32.xlu1 %v1881_v52 }
 0x33d   : > { %v1786_v53 = vpop.f32.mrb[12].mxu1 }
 0x33e   : > { %v3193_v54 = vpop.f32.mrb[13].mxu1  ;;  %v1884_v63 = vsel %vm1257_vm2, %v1786_v53, -inf }
 0x33f   : > { %1885 = vmax.xlane.f32.xlu0 %v1884_v63 }
 0x341   : > { %v4018_v1 = vpop.f32.mrb[14].mxu1 }
 0x342   : > { %v3198_v3 = vpop.f32.mrb[15].mxu1  ;;  %v1887_v6 = vsel %vm1257_vm2, %v4018_v1, -inf }
 0x34c   : > { %967 = vrot.lane.b32.xlu1 %v4023_v5, %s3578_s13  ;;  %s3115_s13 = sshll.u32 %s3646_s22, 7 }
 0x350   : > { %970 = vrot.lane.b32.xlu1 %v4023_v5, %s3575_s10  ;;  %s3593_s10 = smov 48  }
 0x355   : > { %964 = vrot.lane.b32.xlu0 %v4023_v5, %s3576_s28 }
 0x374   : > { %1888 = vmax.xlane.f32.xlu1 %v1887_v6 }
 0x385   : > { %973 = vrot.lane.b32.xlu1 %v4023_v5, %s3577_s12 }
 0x3b4   : > { %v1868_v27 = vpop.xlane.xlu1 %1867 }
 0x3b5   : > { %v1890_v29 = vsub.f32 %v1330_v40, %v1868_v27 }
 0x3b7   : > { %v1898_v33 = vmul.f32 1.442695, %v1890_v29 }
 0x3b8   : > { %v1871_v7 = vpop.xlane.xlu0 %1870 }
 0x3b9   : > { %3377 = vpow2.f32 %v1898_v33  ;;  %v1891_v8 = vsub.f32 %v1406_v59, %v1871_v7 }
 0x3bb   : > { %v1900_v9 = vmul.f32 1.442695, %v1891_v8 }
 0x3bc   : > { %v1874_v10 = vpop.xlane.xlu0 %1873 }
 0x3bd   : > { %3379 = vpow2.f32 %v1900_v9  ;;  %v1892_v11 = vsub.f32 %v1482_v42, %v1874_v10 }
 0x3bf   : > { %v1902_v12 = vmul.f32 1.442695, %v1892_v11 }
 0x3c0   : > { %v1877_v13 = vpop.xlane.xlu1 %1876 }
 0x3c1   : > { %3381 = vpow2.f32 %v1902_v12  ;;  %v1893_v14 = vsub.f32 %v1558_v57, %v1877_v13 }
 0x3c3   : > { %v4035_v15 = vpop.eup %3377  ;;  %v1904_v16 = vmul.f32 1.442695, %v1893_v14 }
 0x3c4   : > { %v1880_v17 = vpop.xlane.xlu0 %1879  ;;  %v1914_v18 = vsel %vm1257_vm2, %v4035_v15, 0.0 }
 0x3c5   : > { %3383 = vpow2.f32 %v1904_v16  ;;  %v1894_v19 = vsub.f32 %v1634_v46, %v1880_v17  ;;  %1915 = vadd.xlane.f32.xlu0 %v1914_v18 }
 0x3c7   : > { %v4039_v20 = vpop.eup %3379  ;;  %v1906_v21 = vmul.f32 1.442695, %v1894_v19 }
 0x3c8   : > { %v1883_v22 = vpop.xlane.xlu1 %1882  ;;  %v1917_v23 = vsel %vm1257_vm2, %v4039_v20, 0.0 }
 0x3c9   : > { %3385 = vpow2.f32 %v1906_v21  ;;  %v1895_v24 = vsub.f32 %v1710_v50, %v1883_v22  ;;  %1918 = vadd.xlane.f32.xlu1 %v1917_v23 }
 0x3cb   : > { %v4043_v25 = vpop.eup %3381  ;;  %v1908_v32 = vmul.f32 1.442695, %v1895_v24 }
 0x3cc   : > { %v968_v37 = vpop.permute.xlu1 %967  ;;  %v1886_v34 = vpop.xlane.xlu0 %1885  ;;  %v1920_v35 = vsel %vm1257_vm2, %v4043_v25, 0.0 }
 0x3cd   : > { %3387 = vpow2.f32 %v1908_v32  ;;  %v1896_v26 = vsub.f32 %v1786_v53, %v1886_v34  ;;  %1921 = vadd.xlane.f32.xlu0 %v1920_v35  ;;  %v985_v38 = vcombine.low %v4023_v5, %v968_v37  ;;  %v986_v39 = vcombine.high %v4023_v5, %v968_v37 }
 0x3cf   : > { %v4047_v28 = vpop.eup %3383  ;;  %v1910_v36 = vmul.f32 1.442695, %v1896_v26  ;;  %v993_v59 = vrot.slane %v985_v38, %v3836_v44  ;;  %v1000_v60 = vrot.slane %v986_v39, %v3836_v44 }
 0x3d0   : > { %v971_v41 = vpop.permute.xlu1 %970  ;;  %v965_v30 = vpop.permute.xlu0 %964  ;;  %v1923_v31 = vsel %vm1257_vm2, %v4047_v28, 0.0 }
 0x3d1   : > { %3389 = vpow2.f32 %v1910_v36  ;;  %v1001_v40 = vcombine.low %v965_v30, %v971_v41  ;;  %v1002_v55 = vcombine.high %v965_v30, %v971_v41  ;;  %1924 = vadd.xlane.f32.xlu1 %v1923_v31 }
 0x3d3   : > { %v4053_v56 = vpop.eup %3385  ;;  %v1009_v61 = vrot.slane %v1001_v40, %v3836_v44  ;;  %v1016_v42 = vrot.slane %v1002_v55, %v3836_v44 }
 0x3d4   : > { %v1926_v43 = vsel %vm1257_vm2, %v4053_v56, 0.0 }
 0x3d5   : > { %v1049_v45 = vcombine.low %v993_v59, %v1009_v61  ;;  %v1050_v57 = vcombine.high %v993_v59, %v1009_v61  ;;  %v1065_v58 = vcombine.low %v1000_v60, %v1016_v42  ;;  %v1066_v62 = vcombine.high %v1000_v60, %v1016_v42  ;;  %1927 = vadd.xlane.f32.xlu0 %v1926_v43 }
 0x3d7   : > { %v4061_v46 = vpop.eup %3387  ;;  %v1057_v47 = vrot.slane %v1049_v45, %v3841_v49  ;;  %v1064_v48 = vrot.slane %v1050_v57, %v3841_v49  ;;  %v1073_v50 = vrot.slane %v1065_v58, %v3841_v49  ;;  %v1080_v51 = vrot.slane %v1066_v62, %v3841_v49 }
 0x3d8   : > { %v1929_v52 = vsel %vm1257_vm2, %v4061_v46, 0.0 }
 0x3d9   : > { %v3072_v53 = vcombine.low %v1057_v47, %v1064_v48  ;;  %v3074_v54 = vcombine.high %v1057_v47, %v1064_v48  ;;  %v3076_v63 = vcombine.low %v1073_v50, %v1080_v51  ;;  %v3078_v2 = vcombine.high %v1073_v50, %v1080_v51  ;;  %1930 = vadd.xlane.f32.xlu1 %v1929_v52 }
 0x3db   : > { %v4069_v3 = vpop.eup %3389  ;;  %v1129_v4 = vrot.slane %v3072_v53, %v3836_v44  ;;  %v1145_v6 = vrot.slane %v3074_v54, %v3836_v44  ;;  %v1161_v27 = vrot.slane %v3076_v63, %v3836_v44  ;;  %v1177_v29 = vrot.slane %v3078_v2, %v3836_v44 }
 0x3dc   : > { %v1932_v33 = vsel %vm1257_vm2, %v4069_v3, 0.0 }
 0x3dd   : > { %1933 = vadd.xlane.f32.xlu0 %v1932_v33  ;;  %v1185_v7 = vcombine.low %v1129_v4, %v1145_v6  ;;  %v1217_v8 = vcombine.low %v1161_v27, %v1177_v29  ;;  %v1186_v9 = vcombine.high %v1129_v4, %v1145_v6  ;;  %v1218_v10 = vcombine.high %v1161_v27, %v1177_v29 }
 0x3df   : > { %v1193_v11 = vrot.slane %v1185_v7, %v3841_v49  ;;  %v1225_v12 = vrot.slane %v1217_v8, %v3841_v49  ;;  %v1200_v13 = vrot.slane %v1186_v9, %v3841_v49  ;;  %v1232_v14 = vrot.slane %v1218_v10, %v3841_v49 }
 0x3e1   : > { %v1249_v16 = vcombine.low %v1193_v11, %v1225_v12  ;;  %v1250_v17 = vcombine.high %v1193_v11, %v1225_v12  ;;  %v1251_v18 = vcombine.low %v1200_v13, %v1232_v14  ;;  %v1252_v19 = vcombine.high %v1200_v13, %v1232_v14 }
 0x3e3   : > { %3200 = vmatpush3.msra.mxu0 %v1249_v16  ;;  %3205 = vmatpush3.msra.mxu1 %v1250_v17 }
 0x3e4   : > { %3209 = vmatprep.subr.mxu0 %v3574_v0  ;;  %3214 = vmatprep.subr.mxu1 %v3574_v0 }
 0x3ea   : > { %979 = vrot.lane.b32.xlu1 %v4023_v5, %s3579_s7  ;;  %s268_s7 = scalar_lea.vmem [#allocation8], %s3051_s15  ;;  %s3594_s15 = smov [#allocation8]  }
 0x3ee   : > { %982 = vrot.lane.b32.xlu1 %v4023_v5, %s3582_s8 }
 0x401   : > { %v1889_v21 = vpop.xlane.xlu1 %1888 }
 0x402   : > { %v1897_v22 = vsub.f32 %v4018_v1, %v1889_v21 }
 0x404   : > { %v1912_v23 = vmul.f32 1.442695, %v1897_v22 }
 0x405   : > { %v974_v37 = vpop.permute.xlu1 %973 }
 0x406   : > { %3391 = vpow2.f32 %v1912_v23 }
 0x410   : > { %v4088_v24 = vpop.eup %3391 }
 0x411   : > { %v1935_v32 = vsel %vm1257_vm2, %v4088_v24, 0.0 }
 0x412   : > { %1936 = vadd.xlane.f32.xlu0 %v1935_v32 }
 0x428   : > { %976 = vrot.lane.b32.xlu0 %v4023_v5, %s3580_s6  ;;  %s2954_s6 = sshll.u32 %s268_s7, 4  ;;  %s4200_s6 = int_to_ptr.vmem [resolvable:$true] %s2954_s6 }
 0x429   : > { %s3495_s22 = scalar_lea.vmem %s4200_s6, 128 }
 0x42a   : > { %p3496_p11 = scmp.ne.s32.totalorder %s4200_s6, %s3495_s22 }
 0x42c   : > { %p3497_p1 = pnand %p3496_p11, %p4262_p0 }
 0x42e   : > { %p3498_p3 = pneg %p3497_p1 }
 0x452   : > { %v1916_v34 = vpop.xlane.xlu0 %1915 }
 0x453   : > { %3393 = vrcp.f32 %v1916_v34 }
 0x456   : > { %v1919_v35 = vpop.xlane.xlu1 %1918 }
 0x457   : > { %3395 = vrcp.f32 %v1919_v35 }
 0x45a   : > { %v1922_v26 = vpop.xlane.xlu0 %1921 }
 0x45b   : > { %3397 = vrcp.f32 %v1922_v26 }
 0x45d   : > { %v3394_v38 = vpop.eup %3393 }
 0x45e   : > { %v1946_v1 = vmul.f32 %v3394_v38, %v4035_v15  ;;  %v1925_v39 = vpop.xlane.xlu1 %1924 }
 0x45f   : > { %3399 = vrcp.f32 %v1925_v39 }
 0x460   : > { %3202 = vmatmul.mubr.msk.f32.vlgmr.msra.gmra.mrb[2].mxu0 %vm1257_vm2, %v1946_v1 }
 0x461   : > { %v3396_v36 = vpop.eup %3395  ;;  %3210 = vmatpush3.msra.mxu0 %v1251_v18  ;;  %3211 = vmatprep.mubr.msk.f32.mxu0 %vm3585_vm1, %v3574_v0 }
 0x462   : > { %v1947_v5 = vmul.f32 %v3396_v36, %v4039_v20  ;;  %3219 = vmatprep.subr.mxu0 %v3574_v0  ;;  %v1928_v31 = vpop.xlane.xlu0 %1927 }
 0x463   : > { %3401 = vrcp.f32 %v1928_v31 }
 0x464   : > { %3207 = vmatmul.mubr.msk.f32.vlgmr.msra.gmra.mrb[16].mxu1 %vm1257_vm2, %v1947_v5 }
 0x465   : > { %v3398_v41 = vpop.eup %3397  ;;  %3215 = vmatpush3.msra.mxu1 %v1252_v19  ;;  %3216 = vmatprep.mubr.msk.f32.mxu1 %vm3585_vm1, %v3574_v0 }
 0x466   : > { %v1948_v15 = vmul.f32 %v3398_v41, %v4043_v25  ;;  %3224 = vmatprep.subr.mxu1 %v3574_v0  ;;  %v1931_v40 = vpop.xlane.xlu1 %1930 }
 0x467   : > { %3403 = vrcp.f32 %v1931_v40 }
 0x468   : > { %3212 = vmatmul.mubr.msk.f32.vlgmr.msra.gmra.mrb[4].mxu0 %vm1257_vm2, %v1948_v15 }
 0x469   : > { %v3400_v30 = vpop.eup %3399  ;;  %3221 = vmatprep.mubr.msk.f32.mxu0 %vm3585_vm1, %v3574_v0 }
 0x46a   : > { %v1949_v20 = vmul.f32 %v3400_v30, %v4047_v28  ;;  %v1934_v55 = vpop.xlane.xlu0 %1933  ;;  %v980_v59 = vpop.permute.xlu1 %979 }
 0x46b   : > { %v1017_v60 = vcombine.low %v974_v37, %v980_v59  ;;  %v1018_v61 = vcombine.high %v974_v37, %v980_v59  ;;  %3405 = vrcp.f32 %v1934_v55 }
 0x46c   : > { %3217 = vmatmul.mubr.msk.f32.vlgmr.msra.gmra.mrb[18].mxu1 %vm1257_vm2, %v1949_v20 }
 0x46d   : > { %3226 = vmatprep.mubr.msk.f32.mxu1 %vm3585_vm1, %v3574_v0  ;;  %v1025_v58 = vrot.slane %v1017_v60, %v3836_v44  ;;  %v1032_v28 = vrot.slane %v1018_v61, %v3836_v44  ;;  %v3402_v10 = vpop.eup %3401 }
 0x46e   : > { %v983_v42 = vpop.permute.xlu1 %982  ;;  %v1950_v34 = vmul.f32 %v3402_v10, %v4053_v56 }
 0x471   : > { %v3404_v16 = vpop.eup %3403 }
 0x472   : > { %v1951_v35 = vmul.f32 %v3404_v16, %v4061_v46  ;;  %v2855_v16 = vld [vmem:[#allocation7 + $0x20] sm:$0xff] }
 0x475   : > { %v3406_v19 = vpop.eup %3405 }
 0x476   : > { %v1952_v1 = vmul.f32 %v3406_v19, %v4069_v3 }
 0x49f   : > { %v1937_v25 = vpop.xlane.xlu0 %1936 }
 0x4a0   : > { %3407 = vrcp.f32 %v1937_v25 }
 0x4a3   : > { %v977_v43 = vpop.permute.xlu0 %976 }
 0x4a4   : > { %v1033_v45 = vcombine.low %v977_v43, %v983_v42  ;;  %v1034_v57 = vcombine.high %v977_v43, %v983_v42 }
 0x4a6   : > { %v1041_v62 = vrot.slane %v1033_v45, %v3836_v44  ;;  %v1048_v47 = vrot.slane %v1034_v57, %v3836_v44 }
 0x4a8   : > { %v1081_v48 = vcombine.low %v1025_v58, %v1041_v62  ;;  %v1082_v50 = vcombine.high %v1025_v58, %v1041_v62  ;;  %v1097_v51 = vcombine.low %v1032_v28, %v1048_v47  ;;  %v1098_v52 = vcombine.high %v1032_v28, %v1048_v47 }
 0x4aa   : > { %v1089_v53 = vrot.slane %v1081_v48, %v3841_v49  ;;  %v1096_v54 = vrot.slane %v1082_v50, %v3841_v49  ;;  %v1105_v63 = vrot.slane %v1097_v51, %v3841_v49  ;;  %v1112_v2 = vrot.slane %v1098_v52, %v3841_v49  ;;  %v3408_v37 = vpop.eup %3407  ;;  %v2851_v51 = vld [vmem:[#allocation7] sm:$0xff]  ;;  %v2852_v52 = vld [vmem:[#allocation7 + $0x8] sm:$0xff] }
 0x4ab   : > { %v1953_v39 = vmul.f32 %v3408_v37, %v4088_v24 }
 0x4ac   : > { %v3073_v4 = vcombine.low %v1089_v53, %v1096_v54  ;;  %v3075_v6 = vcombine.high %v1089_v53, %v1096_v54  ;;  %v3077_v27 = vcombine.low %v1105_v63, %v1112_v2  ;;  %v3079_v29 = vcombine.high %v1105_v63, %v1112_v2 }
 0x4ae   : > { %v1136_v33 = vrot.slane %v3073_v4, %v3836_v44  ;;  %v1152_v7 = vrot.slane %v3075_v6, %v3836_v44  ;;  %v1168_v8 = vrot.slane %v3077_v27, %v3836_v44  ;;  %v1184_v9 = vrot.slane %v3079_v29, %v3836_v44  ;;  %v2853_v6 = vld [vmem:[#allocation7 + $0x10] sm:$0xff]  ;;  %v2854_v27 = vld [vmem:[#allocation7 + $0x18] sm:$0xff] }
 0x4af   : > { %v3586_v4 = vmov 0.0|0.0   ;;  %v3275_v29 = vpack.c.bf16 %v2852_v52, %v2851_v51  ;;  %v3278_v10 = vpack.c.bf16 %v2854_v27, %v2853_v6 }
 0x4b0   : > { %v1201_v11 = vcombine.low %v1136_v33, %v1152_v7  ;;  %v1233_v12 = vcombine.low %v1168_v8, %v1184_v9  ;;  %v1202_v13 = vcombine.high %v1136_v33, %v1152_v7  ;;  %v1234_v14 = vcombine.high %v1168_v8, %v1184_v9 }
 0x4b2   : > { %v1209_v17 = vrot.slane %v1201_v11, %v3841_v49  ;;  %v1241_v18 = vrot.slane %v1233_v12, %v3841_v49  ;;  %v1216_v21 = vrot.slane %v1202_v13, %v3841_v49  ;;  %v1248_v22 = vrot.slane %v1234_v14, %v3841_v49 }
 0x4b4   : > { %v1253_v23 = vcombine.low %v1209_v17, %v1241_v18  ;;  %v1254_v32 = vcombine.high %v1209_v17, %v1241_v18  ;;  %v1255_v26 = vcombine.low %v1216_v21, %v1248_v22  ;;  %v1256_v38 = vcombine.high %v1216_v21, %v1248_v22  ;;  %v2856_v17 = vld [vmem:[#allocation7 + $0x28] sm:$0xff] }
 0x4b6   : > { %3220 = vmatpush3.msra.mxu0 %v1253_v23  ;;  %3225 = vmatpush3.msra.mxu1 %v1254_v32  ;;  %v3281_v23 = vpack.c.bf16 %v2856_v17, %v2855_v16 }
 0x4b7   : > { %3222 = vmatmul.mubr.msk.f32.vlgmr.msra.gmra.mrb[6].mxu0 %vm1257_vm2, %v1950_v34  ;;  %3227 = vmatmul.mubr.msk.f32.vlgmr.msra.gmra.mrb[20].mxu1 %vm1257_vm2, %v1951_v35 }
 0x4b8   : > { %3229 = vmatprep.subr.mxu0 %v3574_v0  ;;  %3234 = vmatprep.subr.mxu1 %v3574_v0 }
 0x4b9   : > { %3230 = vmatpush3.msra.mxu0 %v1255_v26  ;;  %3235 = vmatpush3.msra.mxu1 %v1256_v38 }
 0x4ba   : > { %3231 = vmatprep.mubr.msk.f32.mxu0 %vm3585_vm1, %v3574_v0  ;;  %3236 = vmatprep.mubr.msk.f32.mxu1 %vm3585_vm1, %v3574_v0 }
 0x4bb   : > { %3232 = vmatmul.mubr.msk.f32.vlgmr.msra.gmra.mrb[8].mxu0 %vm1257_vm2, %v1952_v1  ;;  %3237 = vmatmul.mubr.msk.f32.vlgmr.msra.gmra.mrb[22].mxu1 %vm1257_vm2, %v1953_v39 }
 0x4bc   : > { %3255 = vmatprep.mubr.msk.f32.mxu0 %vm3585_vm1, %v3574_v0  ;;  %3274 = vmatprep.subr.bf16.mxu0 %v3586_v4 }
 0x4bd   : > { %3276 = vmatpush3.bf16.msra.mxu0 %v3275_v29 }
 0x4be   : > { %3277 = vmatprep.subr.bf16.mxu0 %v3586_v4 }
 0x4c1   : > { %3279 = vmatpush3.bf16.msra.mxu0 %v3278_v10 }
 0x4c2   : > { %3280 = vmatprep.subr.bf16.mxu0 %v3586_v4 }
 0x4c5   : > { %3282 = vmatpush3.bf16.msra.mxu0 %v3281_v23 }
 0x4c6   : > { %3283 = vmatprep.subr.bf16.mxu0 %v3586_v4 }
 0x533   : > { %v2023_v56 = vpop.f32.mrb[2].mxu0 }
 0x534   : > { %v3203_v46 = vpop.f32.mrb[3].mxu0 }
 0x537   : > { %v2096_v3 = vpop.f32.mrb[16].mxu1 }
 0x538   : > { %v3208_v36 = vpop.f32.mrb[17].mxu1 }
 0x53b   : > { %v2169_v24 = vpop.f32.mrb[4].mxu0 }
 0x53c   : > { %v2538_v5 = vcombine.low %v2023_v56, %v2169_v24  ;;  %v2539_v41 = vcombine.high %v2023_v56, %v2169_v24  ;;  %v3213_v15 = vpop.f32.mrb[5].mxu0 }
 0x53e   : > { %v2546_v55 = vrot.slane %v2538_v5, %v3836_v44  ;;  %v2553_v59 = vrot.slane %v2539_v41, %v3836_v44 }
 0x53f   : > { %v2242_v30 = vpop.f32.mrb[18].mxu1 }
 0x540   : > { %v2554_v20 = vcombine.low %v2096_v3, %v2242_v30  ;;  %v2555_v31 = vcombine.high %v2096_v3, %v2242_v30  ;;  %v3218_v40 = vpop.f32.mrb[19].mxu1 }
 0x542   : > { %v2562_v25 = vrot.slane %v2554_v20, %v3836_v44  ;;  %v2569_v0 = vrot.slane %v2555_v31, %v3836_v44 }
 0x544   : > { %v2602_v60 = vcombine.low %v2546_v55, %v2562_v25  ;;  %v2603_v61 = vcombine.high %v2546_v55, %v2562_v25  ;;  %v2618_v42 = vcombine.low %v2553_v59, %v2569_v0  ;;  %v2619_v43 = vcombine.high %v2553_v59, %v2569_v0 }
 0x546   : > { %v2610_v45 = vrot.slane %v2602_v60, %v3841_v49  ;;  %v2617_v57 = vrot.slane %v2603_v61, %v3841_v49  ;;  %v2626_v58 = vrot.slane %v2618_v42, %v3841_v49  ;;  %v2633_v28 = vrot.slane %v2619_v43, %v3841_v49  ;;  %v2857_v60 = vld [vmem:[#allocation7 + $0x30] sm:$0xff]  ;;  %v2858_v61 = vld [vmem:[#allocation7 + $0x38] sm:$0xff] }
 0x547   : > { %v3284_v42 = vpack.c.bf16 %v2858_v61, %v2857_v60 }
 0x548   : > { %v3104_v62 = vcombine.low %v2610_v45, %v2617_v57  ;;  %v3106_v47 = vcombine.high %v2610_v45, %v2617_v57  ;;  %v3108_v48 = vcombine.low %v2626_v58, %v2633_v28  ;;  %v3110_v50 = vcombine.high %v2626_v58, %v2633_v28 }
 0x549   : > { %3285 = vmatpush3.bf16.msra.mxu0 %v3284_v42 }
 0x54a   : > { %v2682_v53 = vrot.slane %v3104_v62, %v3836_v44  ;;  %v2698_v54 = vrot.slane %v3106_v47, %v3836_v44  ;;  %v2714_v63 = vrot.slane %v3108_v48, %v3836_v44  ;;  %v2730_v2 = vrot.slane %v3110_v50, %v3836_v44 }
 0x54c   : > { %v2739_v33 = vcombine.high %v2682_v53, %v2698_v54  ;;  %v2771_v7 = vcombine.high %v2714_v63, %v2730_v2  ;;  %v2738_v8 = vcombine.low %v2682_v53, %v2698_v54  ;;  %v2770_v9 = vcombine.low %v2714_v63, %v2730_v2 }
 0x54e   : > { %v2753_v11 = vrot.slane %v2739_v33, %v3841_v49  ;;  %v2785_v12 = vrot.slane %v2771_v7, %v3841_v49  ;;  %v4159_v13 = vrot.slane %v2738_v8, %v3841_v49  ;;  %v4162_v14 = vrot.slane %v2770_v9, %v3841_v49 }
 0x550   : > { %v2804_v18 = vcombine.low %v2753_v11, %v2785_v12  ;;  %v2803_v19 = vcombine.high %v4159_v13, %v4162_v14  ;;  %v2805_v21 = vcombine.high %v2753_v11, %v2785_v12  ;;  %v2802_v22 = vcombine.low %v4159_v13, %v4162_v14 }
 0x552   : > { %2815 = vrot.lane.b32.xlu1 %v2804_v18, %s3587_s9  ;;  %2811 = vrot.lane.b32.xlu0 %v2803_v19, %s3588_s11  ;;  %s4198_s9 = scalar_lea.hbm %s4248_s5, %s3115_s13  ;;  %s2941_s11 = scalar_lea.sflag [#allocation4], %s3794_s14 }
 0x556   : > { %2819 = vrot.lane.b32.xlu0 %v2805_v21, %s3589_s17  ;;  %v3112_v21 = vld [vmem:[%s4247_s4] ss:$0 sm:$0xff]  ;;  %s3499_s17 = sshll.u32 %s3594_s15, 4  ;;  %s3500_s17 = int_to_ptr.vmem [resolvable:$false] %s3499_s17 }
 0x557   : > { %p3502_p5 = scmp.lt.s32.totalorder %s4200_s6, %s3500_s17 }
 0x58a   : > { %v2315_v32 = vpop.f32.mrb[6].mxu0  ;;  %v2388_v37 = vpop.f32.mrb[20].mxu1 }
 0x58b   : > { %v3223_v34 = vpop.f32.mrb[7].mxu0  ;;  %v3228_v35 = vpop.f32.mrb[21].mxu1 }
 0x58e   : > { %v2461_v26 = vpop.f32.mrb[8].mxu0  ;;  %v2534_v38 = vpop.f32.mrb[22].mxu1 }
 0x58f   : > { %v2570_v1 = vcombine.low %v2315_v32, %v2461_v26  ;;  %v2571_v39 = vcombine.high %v2315_v32, %v2461_v26  ;;  %v2586_v56 = vcombine.low %v2388_v37, %v2534_v38  ;;  %v2587_v46 = vcombine.high %v2388_v37, %v2534_v38  ;;  %v3233_v3 = vpop.f32.mrb[9].mxu0  ;;  %v3238_v36 = vpop.f32.mrb[23].mxu1 }
 0x591   : > { %v2578_v24 = vrot.slane %v2570_v1, %v3836_v44  ;;  %v2585_v5 = vrot.slane %v2571_v39, %v3836_v44  ;;  %v2594_v41 = vrot.slane %v2586_v56, %v3836_v44  ;;  %v2601_v15 = vrot.slane %v2587_v46, %v3836_v44 }
 0x593   : > { %v2634_v30 = vcombine.low %v2578_v24, %v2594_v41  ;;  %v2635_v20 = vcombine.high %v2578_v24, %v2594_v41  ;;  %v2650_v31 = vcombine.low %v2585_v5, %v2601_v15  ;;  %v2651_v40 = vcombine.high %v2585_v5, %v2601_v15 }
 0x595   : > { %v2642_v55 = vrot.slane %v2634_v30, %v3841_v49  ;;  %v2649_v59 = vrot.slane %v2635_v20, %v3841_v49  ;;  %v2658_v25 = vrot.slane %v2650_v31, %v3841_v49  ;;  %v2665_v0 = vrot.slane %v2651_v40, %v3841_v49 }
 0x597   : > { %v3105_v43 = vcombine.low %v2642_v55, %v2649_v59  ;;  %v3107_v45 = vcombine.high %v2642_v55, %v2649_v59  ;;  %v3109_v57 = vcombine.low %v2658_v25, %v2665_v0  ;;  %v3111_v58 = vcombine.high %v2658_v25, %v2665_v0 }
 0x599   : > { %v2689_v28 = vrot.slane %v3105_v43, %v3836_v44  ;;  %v2705_v62 = vrot.slane %v3107_v45, %v3836_v44  ;;  %v2721_v47 = vrot.slane %v3109_v57, %v3836_v44  ;;  %v2737_v48 = vrot.slane %v3111_v58, %v3836_v44 }
 0x59b   : > { %v2754_v50 = vcombine.low %v2689_v28, %v2705_v62  ;;  %v2786_v51 = vcombine.low %v2721_v47, %v2737_v48  ;;  %v2755_v52 = vcombine.high %v2689_v28, %v2705_v62  ;;  %v2787_v53 = vcombine.high %v2721_v47, %v2737_v48 }
 0x59d   : > { %v2762_v54 = vrot.slane %v2754_v50, %v3841_v49  ;;  %v2794_v63 = vrot.slane %v2786_v51, %v3841_v49  ;;  %v2769_v2 = vrot.slane %v2755_v52, %v3841_v49  ;;  %v2801_v4 = vrot.slane %v2787_v53, %v3841_v49 }
 0x59f   : > { %v2807_v6 = vcombine.high %v2762_v54, %v2794_v63  ;;  %v2806_v27 = vcombine.low %v2762_v54, %v2794_v63  ;;  %v2809_v29 = vcombine.high %v2769_v2, %v2801_v4  ;;  %v2808_v33 = vcombine.low %v2769_v2, %v2801_v4 }
 0x5a1   : > { %2827 = vrot.lane.b32.xlu0 %v2807_v6, %s3590_s23  ;;  %2823 = vrot.lane.b32.xlu1 %v2806_v27, %s3591_s24  ;;  %s3501_s23 = scalar_lea.vmem %s3500_s17, 256 }
 0x5a2   : > { %p3503_p9 = scmp.lt.s32.totalorder %s3501_s23, %s3495_s22 }
 0x5a4   : > { %p3504_p12 = por %p3503_p9, %p3502_p5 }
 0x5a5   : > { %2835 = vrot.lane.b32.xlu0 %v2809_v29, %s3592_s26  ;;  %2831 = vrot.lane.b32.xlu1 %v2808_v33, %s3593_s10 }
 0x5a6   : > { %p3505_p2 = pnand %p3504_p12, %p3498_p3 }
 0x5c4   : > { %v2812_v44 = vpop.permute.xlu0 %2811  ;;  %v2816_v7 = vpop.permute.xlu1 %2815 }
 0x5c5   : > { %v2838_v8 = vsel %vm1257_vm2, %v2802_v22, %v2812_v44 }
 0x5c6   : > { %v2840_v9 = vsel %vm2839_vm3, %v2838_v8, %v2816_v7 }
 0x5c8   : > { %v2820_v49 = vpop.permute.xlu0 %2819 }
 0x5c9   : > { %v2842_v10 = vsel %vm2841_vm4, %v2840_v9, %v2820_v49 }
 0x613   : > { %v2824_v11 = vpop.permute.xlu1 %2823  ;;  %v2828_v12 = vpop.permute.xlu0 %2827 }
 0x614   : > { %v2844_v16 = vsel %vm2843_vm5, %v2842_v10, %v2824_v11 }
 0x615   : > { %v2846_v17 = vsel %vm2845_vm6, %v2844_v16, %v2828_v12 }
 0x617   : > { %v2832_v18 = vpop.permute.xlu1 %2831  ;;  %v2836_v13 = vpop.permute.xlu0 %2835 }
 0x618   : > { %v2848_v14 = vsel %vm2847_vm7, %v2846_v17, %v2832_v18 }
 0x619   : > { %v2850_v19 = vsel %vm2849_vm8, %v2848_v14, %v2836_v13 }
 0x61a   : > { %3256 = vmatmul.mubr.msk.f32.vlgmr.msra.gmra.mrb[10].mxu0 %vm298_vm0, %v2850_v19 }
 0x6ed   : > { %v2935_v22 = vpop.f32.mrb[10].mxu0 }
 0x6ee   : > { %v2936_v23 = vadd.f32 %v3112_v21, %v2935_v22  ;;  %v3257_v32 = vpop.f32.mrb[11].mxu0 }
 0x6f0   : > { %2939 = vst.msk [vmem:[%s268_s7] sm:$0xff] %vm298_vm0, %v2936_v23 }
 0x6f1   : > { %3508 = shalt.err (!%p3505_p2)
}
 0x6f2   : > { %s3509_s14 = scalar_lea.hbm %s4198_s9, 128  ;;  %s3513_s10 = scalar_lea.hbm %s4248_s5, 256 }
 0x6f3   : > { %p3510_p13 = scmp.ne.s32.totalorder %s4198_s9, %s3509_s14  ;;  %p3514_p4 = scmp.lt.u32.totalorder %s4198_s9, %s4248_s5 }
 0x6f4   : > { %p3515_p7 = scmp.lt.u32.totalorder %s3513_s10, %s3509_s14  ;;  %p3517_p11 = scmp.lt.u32.totalorder %s3509_s14, %s4198_s9 }
 0x6f5   : > { %p3511_p6 = pnand %p3510_p13, %p4262_p0 }
 0x6f6   : > { %p3516_p8 = por %p3515_p7, %p3514_p4 }
 0x6f7   : > { %p3512_p10 = pneg %p3511_p6 }
 0x6f8   : > { %p3518_p1 = por %p3517_p11, %p3516_p8 }
 0x6fa   : > { %p3519_p3 = pnand %p3518_p1, %p3512_p10 }
 0x6fc   : > { %3522 = shalt.err (!%p3519_p3)
}
 0x6fd   : > { %3296 = dma.vmem_to_hbm [thread:$0]  (%p4262_p0), %s4200_s6, 128, %s4198_s9, %s2941_s11  }
 0x6fe PF: > { %s2966_s13 = sand.u32 1, %s3553_s18   ;;  %p4263_p5 = scmp.ne.s32.totalorder %s4253_s25, 0 }
 0x6ff   : > { %p4264_p9 = scmp.ge.s32.totalorder %s3565_s21, 2  ;;  %s2967_s7 = scalar_lea.sflag [#allocation4], %s2966_s13 }
 0x701   : > { %p3310_p12 = pnand %p4264_p9, %p4263_p5 }
 0x703   : > { %3548 = dma.done.wait (!%p3310_p12), %s2967_s7, 128  }
 0x704   : > { %3550 = vsyncadd (!%p3310_p12), %s2967_s7, 4294967168  ;;  %p19_p2 = scmp.ge.s32.totalorder %s3735_s16, 4   ;;  %s4265_s18 = smov %s3557_s19 }
 0x705   : > { %s4266_s19 = smov %s3561_s20  ;;  %s4267_s20 = smov %s3744_s27 }
 0x706   : > { %s4268_s21 = smov %s3735_s16  ;;  %21 = sbr.rel (!%p19_p2) target bundleno = 6 (0x6), region = 93 }
 0x70d   :  { %2972 = vsyncpa [#allocation3], 1 }
 0x70e   :  { %2974 = vsyncpa [#allocation3 + $0x1], 1 }
 0x70f   :  { %2975 = vsyncpa [#allocation6], 1 }
 0x710   :  { %2976 = vsyncpa [#allocation4], 1 }
 0x711   :  { %2978 = vsyncpa [#allocation4 + $0x1], 1 }

</bundles_post_ra>
